<compile_context>
chip_gen: v7x
topology: tpu7x:2x2x1
jax: 0.10.0
libtpu: 0.0.40
codegen_flags: <defaults>
</compile_context>

<pallas_src>
import functools

import numpy as np
import jax
import jax.numpy as jnp
from jax.experimental import pallas as pl
from jax.experimental.pallas import tpu as pltpu


# ----------------------------------------------------------------------------
# Parameter construction (deterministic, plain numpy "glue")
# ----------------------------------------------------------------------------
def _round_up(x: int, m: int) -> int:
    return ((x + m - 1) // m) * m


def hann_window(n_fft: int) -> np.ndarray:
    # periodic ("fftbins=True") hann, matches librosa/scipy default
    n = np.arange(n_fft, dtype=np.float64)
    return (0.5 - 0.5 * np.cos(2.0 * np.pi * n / n_fft)).astype(np.float32)


def dft_matrices(n_fft: int):
    # rFFT as two real matmuls:  re = x @ C,  im = x @ S   (shapes (n_fft, n_freq))
    n_freq = 1 + n_fft // 2
    n = np.arange(n_fft, dtype=np.float64)[:, None]
    k = np.arange(n_freq, dtype=np.float64)[None, :]
    ang = 2.0 * np.pi * n * k / n_fft
    return np.cos(ang).astype(np.float32), (-np.sin(ang)).astype(np.float32)


def chroma_filterbank(sr, n_fft, n_chroma=12, tuning=0.0, ctroct=5.0,
                      octwidth=2.0, base_c=True) -> np.ndarray:
    """Deterministic re-implementation of librosa.filters.chroma."""
    frequencies = np.linspace(0, sr, n_fft, endpoint=False)[1:]
    a440 = 440.0 * 2.0 ** (tuning / n_chroma)
    frqbins = n_chroma * np.log2(frequencies / (a440 / 16.0))
    frqbins = np.concatenate(([frqbins[0] - 1.5 * n_chroma], frqbins))
    binwidthbins = np.concatenate(
        (np.maximum(frqbins[1:] - frqbins[:-1], 1.0), [1.0]))
    D = np.subtract.outer(frqbins, np.arange(0, n_chroma, dtype=np.float64)).T
    n_chroma2 = np.round(float(n_chroma) / 2)
    D = np.remainder(D + n_chroma2 + 10 * n_chroma, n_chroma) - n_chroma2
    wts = np.exp(-0.5 * (2.0 * D / np.tile(binwidthbins, (n_chroma, 1))) ** 2)
    col_norm = np.maximum(np.sqrt(np.sum(wts ** 2, axis=0, keepdims=True)),
                          np.finfo(np.float64).tiny)
    wts = wts / col_norm
    if octwidth is not None:
        wts *= np.tile(
            np.exp(-0.5 * (((frqbins / n_chroma - ctroct) / octwidth) ** 2)),
            (n_chroma, 1))
    if base_c:
        wts = np.roll(wts, -3 * (n_chroma // 12), axis=0)
    return np.ascontiguousarray(wts[:, : int(1 + n_fft // 2)]).astype(np.float32)


# ----------------------------------------------------------------------------
# Pallas kernel: in-kernel framing -> one K=n_fft bf16 MXU matmul
#                -> fused power+chroma projection (f32) -> per-frame inf-norm
# ----------------------------------------------------------------------------
def _chroma_kernel(span_ref,    # VMEM (auto-pipelined): (g, f_tile+ns-1) bf16
                                #   [fallback ns==1: (n_fft, f_tile) bf16 == framesT]
                   w_ref,       # VMEM (whole, single-buffered): (w_cols, n_fft) bf16
                   fb_ref,      # VMEM (whole, single-buffered): (n_chroma, w_cols) f32
                   out_ref,     # VMEM: (n_chroma, f_tile) f32 output block
                   frames_ref,  # VMEM scratch: (n_fft, f_tile) bf16, frames on lanes
                   *, f_tile, ns, g):
    # ---- in-kernel framing:
    #      framesT[j*g:(j+1)*g, f] = y[(tile*f_tile + f + j)*g : +g]
    if ns == 1:
        frames_t = span_ref[...]
    else:
        for j in range(ns):            # unrolled at trace time (ns = n_fft // hop)
            frames_ref[pl.ds(j * g, g), :] = span_ref[:, pl.ds(j, f_tile)]
        frames_t = frames_ref[...]

    # ---- windowed rDFT of the whole tile as ONE bf16 MXU matmul (K = n_fft).
    #      accT[k, f] = Re_k / Im_k of frame f (padding rows of W are zero).
    acc_t = jnp.dot(w_ref[...], frames_t, preferred_element_type=jnp.float32)

    # ---- power + chroma projection fused: fb is duplicated over the Re and Im
    #      halves, so raw = fb2 @ accT^2 == chroma_fb @ |STFT|^2 (frames on lanes)
    sq = acc_t * acc_t
    raw = jnp.dot(fb_ref[...], sq, preferred_element_type=jnp.float32)

    # ---- librosa util.normalize(norm=inf, axis=0): divide each frame by its max
    mx = jnp.max(jnp.abs(raw), axis=0, keepdims=True)
    tiny = jnp.finfo(jnp.float32).tiny
    denom = jnp.where(mx < tiny, jnp.float32(1.0), mx)
    out_ref[...] = raw * pl.reciprocal(denom, approx=True)


def chroma_stft(y: jax.Array, *, sr: int, n_fft: int, hop_length: int,
                n_chroma: int, frame_tile: int = 512) -> jax.Array:
    """y: (n_samples,) float32  ->  chroma: (n_chroma, n_frames) float32."""
    y = y.astype(jnp.float32)
    n_freq = 1 + n_fft // 2
    w_cols = _round_up(2 * n_freq, 128)            # packed [Re ; Im] width

    # ---- center padding (glue) ----
    pad = n_fft // 2
    y_pad = jnp.pad(y, (pad, pad), mode="reflect")
    n_frames = 1 + (y_pad.shape[0] - n_fft) // hop_length

    # ---- frame tiling (multi-tile blocks must be lane-dense multiples of 128) --
    frame_tile = max(128, _round_up(frame_tile, 128))
    n8 = _round_up(n_frames, 8)
    if n8 > frame_tile:
        f_tile = frame_tile
    elif n8 >= 256 and n8 % 128 == 0:
        # free split into >=2 tiles so both v7x TensorCores get work
        f_tile = (n8 // 2) if (n8 // 2) % 128 == 0 else 128
    else:
        f_tile = n8                                # single tile == full block dims
    n_frames_pad = _round_up(n_frames, f_tile)
    num_tiles = n_frames_pad // f_tile

    # ---- per-tile waveform spans, bf16, frames-on-lanes orientation ----
    if n_fft % hop_length == 0:
        # Streaming framing: rows of width g = hop; frame f = rows f .. f+ns-1.
        g, ns = hop_length, n_fft // hop_length
        rows = f_tile + ns - 1
        n_rows = (n_frames_pad - 1) + ns
        need = n_rows * g
        y_ext = jnp.pad(y_pad, (0, max(0, need - y_pad.shape[0])))[:need]
        y_rows = y_ext.astype(jnp.bfloat16).reshape(n_rows, g)
        ridx = (np.arange(num_tiles) * f_tile)[:, None] + np.arange(rows)[None, :]
        spans_t = jnp.swapaxes(y_rows[ridx], 1, 2)         # (num_tiles, g, rows)
        span_shape = (g, rows)
    else:
        # TODO(synk): hop not dividing n_fft -> frames materialized in the
        # wrapper (inflates HBM input traffic ~n_fft/hop); streaming path TBD.
        g, ns = n_fft, 1
        need = (n_frames_pad - 1) * hop_length + n_fft
        y_ext = jnp.pad(y_pad, (0, max(0, need - y_pad.shape[0])))[:need]
        fidx = (np.arange(n_frames_pad) * hop_length)[:, None] + \
               np.arange(n_fft)[None, :]
        frames_all = y_ext.astype(jnp.bfloat16)[fidx]      # (n_frames_pad, n_fft)
        spans_t = jnp.swapaxes(
            frames_all.reshape(num_tiles, f_tile, n_fft), 1, 2)
        span_shape = (n_fft, f_tile)

    # ---- deterministic constants (transposed / packed) ----
    win = hann_window(n_fft)
    cosm, sinm = dft_matrices(n_fft)                       # (n_fft, n_freq)
    wt_np = np.zeros((w_cols, n_fft), np.float32)          # (w_cols, n_fft)
    wt_np[:n_freq, :] = win[None, :] * cosm.T              # window folded in (Re)
    wt_np[n_freq:2 * n_freq, :] = win[None, :] * sinm.T    # (Im)
    wt = jnp.asarray(wt_np, dtype=jnp.bfloat16)            # bf16 MXU operand

    fb = chroma_filterbank(sr, n_fft, n_chroma)            # (n_chroma, n_freq)
    fb2_np = np.zeros((n_chroma, w_cols), np.float32)
    fb2_np[:, :n_freq] = fb                                # Re half
    fb2_np[:, n_freq:2 * n_freq] = fb                      # Im half
    fb2 = jnp.asarray(fb2_np)

    kernel = functools.partial(_chroma_kernel, f_tile=f_tile, ns=ns, g=g)

    out = pl.pallas_call(
        kernel,
        out_shape=jax.ShapeDtypeStruct((n_chroma, n_frames_pad), jnp.float32),
        grid_spec=pltpu.PrefetchScalarGridSpec(
            num_scalar_prefetch=0,
            grid=(num_tiles,),
            in_specs=[
                # per-tile waveform span: auto-pipelined (double-buffered DMA)
                pl.BlockSpec((None,) + span_shape, lambda i: (i, 0, 0)),
                # grid-invariant operands: whole-array VMEM (single-buffered)
                pl.BlockSpec(memory_space=pltpu.MemorySpace.VMEM),   # DFT matrix
                pl.BlockSpec(memory_space=pltpu.MemorySpace.VMEM),   # chroma fb
            ],
            out_specs=pl.BlockSpec((n_chroma, f_tile), lambda i: (0, i)),
            scratch_shapes=[pltpu.VMEM((n_fft, f_tile), jnp.bfloat16)],
        ),
        compiler_params=pltpu.CompilerParams(
            dimension_semantics=("parallel",),      # megacore sharding on v7x
            vmem_limit_bytes=48 * 1024 * 1024),     # headroom below v7x 64 MiB
    )(spans_t, wt, fb2)

    # already lane-dense in librosa layout (n_chroma, n_frames); drop padding
    return out[:, :n_frames]


# ----------------------------------------------------------------------------
if __name__ == "__main__":
    # module hyper-params (small, consistent with ChromaSTFT.__init__)
    sr, n_fft, hop_length, n_chroma = 8000, 256, 64, 12
    n_samples = 1024

    key = jax.random.PRNGKey(0)
    y = jax.random.uniform(key, (n_samples,), dtype=jnp.float32,
                           minval=-1.0, maxval=1.0)

    chroma = chroma_stft(y, sr=sr, n_fft=n_fft, hop_length=hop_length,
                         n_chroma=n_chroma)
    chroma = jax.block_until_ready(chroma)

    expected_frames = 1 + n_samples // hop_length
    assert chroma.shape == (n_chroma, expected_frames), chroma.shape
    assert chroma.dtype == jnp.float32
    assert bool(jnp.all(jnp.isfinite(chroma)))
    # inf-norm normalization => every frame's max is ~1 (approx EUP reciprocal)
    assert bool(jnp.allclose(jnp.max(chroma, axis=0), 1.0, atol=2e-2))

    # pure-JAX f32 reference (rfft) to validate the bf16-MXU / streaming path
    pad = n_fft // 2
    y_pad = jnp.pad(y, (pad, pad), mode="reflect")
    nfr = 1 + (y_pad.shape[0] - n_fft) // hop_length
    idx = (jnp.arange(nfr) * hop_length)[:, None] + jnp.arange(n_fft)[None, :]
    frames = y_pad[idx] * jnp.asarray(hann_window(n_fft))[None, :]
    S = jnp.abs(jnp.fft.rfft(frames, axis=-1)) ** 2
    fb_ref = jnp.asarray(chroma_filterbank(sr, n_fft, n_chroma))
    raw_ref = fb_ref @ S.T
    mx_ref = jnp.max(raw_ref, axis=0, keepdims=True)
    ref = raw_ref / jnp.where(mx_ref < jnp.finfo(jnp.float32).tiny, 1.0, mx_ref)
    max_err = float(jnp.max(jnp.abs(chroma - ref)))
    assert max_err < 0.1, f"max abs diff vs f32 reference = {max_err}"

    print("KERNEL_OK")
</pallas_src>

<mosaic_0001>
module attributes {stable_mosaic.version = 11 : i64} {
  func.func @_chroma_kernel(%arg0: i32, %arg1: memref<1x64x27xbf16, #tpu.memory_space<vmem>>, %arg2: memref<384x256xbf16, #tpu.memory_space<vmem>>, %arg3: memref<12x384xf32, #tpu.memory_space<vmem>>, %arg4: memref<12x24xf32, #tpu.memory_space<vmem>>, %arg5: memref<256x24xbf16, #tpu.memory_space<vmem>>) attributes {dimension_semantics = [#tpu.dimension_semantics<parallel>], iteration_bounds = array<i64: 1>, scalar_prefetch = 0 : i64, scratch_operands = 1 : i64, tpu.core_type = #tpu.core_type<tc>, window_params = [{transform_indices = @transform_0, window_bounds = array<i64: 1, 64, 27>}, {pipeline_mode = #tpu.pipeline_mode<synchronous>, transform_indices = @transform_1, window_bounds = array<i64: 384, 256>}, {pipeline_mode = #tpu.pipeline_mode<synchronous>, transform_indices = @transform_2, window_bounds = array<i64: 12, 384>}, {transform_indices = @transform_3, window_bounds = array<i64: 12, 24>}]} {
    %c0 = arith.constant 0 : index
    %c0_0 = arith.constant 0 : index
    %c0_1 = arith.constant 0 : index
    %0 = vector.load %arg1[%c0, %c0_0, %c0_1] : memref<1x64x27xbf16, #tpu.memory_space<vmem>>, vector<1x64x24xbf16>
    %1 = vector.shape_cast %0 : vector<1x64x24xbf16> to vector<64x24xbf16>
    %c0_2 = arith.constant 0 : index
    %c0_3 = arith.constant 0 : index
    %2 = vector.load %arg5[%c0_2, %c0_3] : memref<256x24xbf16, #tpu.memory_space<vmem>>, vector<64x24xbf16>
    tpu.vector_store %arg5[%c0_2, %c0_3], %1 {strides = array<i32>} : memref<256x24xbf16, #tpu.memory_space<vmem>>, vector<64x24xbf16>,
    %c0_4 = arith.constant 0 : index
    %c0_5 = arith.constant 0 : index
    %c1 = arith.constant 1 : index
    %3 = vector.load %arg1[%c0_4, %c0_5, %c1] : memref<1x64x27xbf16, #tpu.memory_space<vmem>>, vector<1x64x24xbf16>
    %4 = vector.shape_cast %3 : vector<1x64x24xbf16> to vector<64x24xbf16>
    %c64 = arith.constant 64 : index
    %c0_6 = arith.constant 0 : index
    %5 = vector.load %arg5[%c64, %c0_6] : memref<256x24xbf16, #tpu.memory_space<vmem>>, vector<64x24xbf16>
    tpu.vector_store %arg5[%c64, %c0_6], %4 {strides = array<i32>} : memref<256x24xbf16, #tpu.memory_space<vmem>>, vector<64x24xbf16>,
    %c0_7 = arith.constant 0 : index
    %c0_8 = arith.constant 0 : index
    %c2 = arith.constant 2 : index
    %6 = vector.load %arg1[%c0_7, %c0_8, %c2] : memref<1x64x27xbf16, #tpu.memory_space<vmem>>, vector<1x64x24xbf16>
    %7 = vector.shape_cast %6 : vector<1x64x24xbf16> to vector<64x24xbf16>
    %c128 = arith.constant 128 : index
    %c0_9 = arith.constant 0 : index
    %8 = vector.load %arg5[%c128, %c0_9] : memref<256x24xbf16, #tpu.memory_space<vmem>>, vector<64x24xbf16>
    tpu.vector_store %arg5[%c128, %c0_9], %7 {strides = array<i32>} : memref<256x24xbf16, #tpu.memory_space<vmem>>, vector<64x24xbf16>,
    %c0_10 = arith.constant 0 : index
    %c0_11 = arith.constant 0 : index
    %c3 = arith.constant 3 : index
    %9 = vector.load %arg1[%c0_10, %c0_11, %c3] : memref<1x64x27xbf16, #tpu.memory_space<vmem>>, vector<1x64x24xbf16>
    %10 = vector.shape_cast %9 : vector<1x64x24xbf16> to vector<64x24xbf16>
    %c192 = arith.constant 192 : index
    %c0_12 = arith.constant 0 : index
    %11 = vector.load %arg5[%c192, %c0_12] : memref<256x24xbf16, #tpu.memory_space<vmem>>, vector<64x24xbf16>
    tpu.vector_store %arg5[%c192, %c0_12], %10 {strides = array<i32>} : memref<256x24xbf16, #tpu.memory_space<vmem>>, vector<64x24xbf16>,
    %c0_13 = arith.constant 0 : index
    %c0_14 = arith.constant 0 : index
    %12 = vector.load %arg5[%c0_13, %c0_14] : memref<256x24xbf16, #tpu.memory_space<vmem>>, vector<256x24xbf16>
    %c0_15 = arith.constant 0 : index
    %c0_16 = arith.constant 0 : index
    %13 = vector.load %arg2[%c0_15, %c0_16] : memref<384x256xbf16, #tpu.memory_space<vmem>>, vector<384x256xbf16>
    %cst = arith.constant dense<0.000000e+00> : vector<384x24xf32>
    %14 = tpu.matmul %13, %12, %cst {dimension_numbers = #tpu.dot_dimension_numbers<[1], [0], [0], [1], [0, 0, 1, 1], [], []>} : vector<384x256xbf16>, vector<256x24xbf16>, vector<384x24xf32> -> vector<384x24xf32>
    %15 = arith.mulf %14, %14 : vector<384x24xf32>
    %c0_17 = arith.constant 0 : index
    %c0_18 = arith.constant 0 : index
    %16 = vector.load %arg3[%c0_17, %c0_18] : memref<12x384xf32, #tpu.memory_space<vmem>>, vector<12x384xf32>
    %cst_19 = arith.constant dense<0.000000e+00> : vector<12x24xf32>
    %17 = tpu.matmul %16, %15, %cst_19 {dimension_numbers = #tpu.dot_dimension_numbers<[1], [0], [0], [1], [0, 0, 1, 1], [], []>} : vector<12x384xf32>, vector<384x24xf32>, vector<12x24xf32> -> vector<12x24xf32>
    %18 = math.absf %17 : vector<12x24xf32>
    %cst_20 = arith.constant dense<0xFF800000> : vector<24xf32>
    %19 = vector.multi_reduction <maximumf>, %18, %cst_20 [0] : vector<12x24xf32> to vector<24xf32>
    %20 = vector.shape_cast %19 : vector<24xf32> to vector<1x24xf32>
    %cst_21 = arith.constant 1.17549435E-38 : f32
    %21 = vector.broadcast %cst_21 : f32 to vector<1x24xf32>
    %22 = arith.cmpf olt, %20, %21 : vector<1x24xf32>
    %cst_22 = arith.constant 1.000000e+00 : f32
    %23 = vector.broadcast %cst_22 : f32 to vector<1x24xf32>
    %24 = arith.select %22, %23, %20 : vector<1x24xi1>, vector<1x24xf32>
    %25 = tpu.reciprocal %24 {approx = true} : vector<1x24xf32> -> vector<1x24xf32>
    %26 = vector.broadcast %25 : vector<1x24xf32> to vector<12x24xf32>
    %27 = arith.mulf %17, %26 : vector<12x24xf32>
    %c0_23 = arith.constant 0 : index
    %c0_24 = arith.constant 0 : index
    %28 = vector.load %arg4[%c0_23, %c0_24] : memref<12x24xf32, #tpu.memory_space<vmem>>, vector<12x24xf32>
    tpu.vector_store %arg4[%c0_23, %c0_24], %27 {strides = array<i32>} : memref<12x24xf32, #tpu.memory_space<vmem>>, vector<12x24xf32>,
    return
  }
  func.func @transform_0(%arg0: i32) -> (i32, i32, i32) {
    %c0_i32 = arith.constant 0 : i32
    %c0_i32_0 = arith.constant 0 : i32
    %c0_i32_1 = arith.constant 0 : i32
    return %arg0, %c0_i32, %c0_i32_0 : i32, i32, i32
  }
  func.func @transform_1(%arg0: i32) -> (i32, i32) {
    %c0_i32 = arith.constant 0 : i32
    %c0_i32_0 = arith.constant 0 : i32
    %c0_i32_1 = arith.constant 0 : i32
    return %c0_i32, %c0_i32_0 : i32, i32
  }
  func.func @transform_2(%arg0: i32) -> (i32, i32) {
    %c0_i32 = arith.constant 0 : i32
    %c0_i32_0 = arith.constant 0 : i32
    %c0_i32_1 = arith.constant 0 : i32
    return %c0_i32, %c0_i32_0 : i32, i32
  }
  func.func @transform_3(%arg0: i32) -> (i32, i32) {
    %c0_i32 = arith.constant 0 : i32
    %c0_i32_0 = arith.constant 0 : i32
    return %c0_i32, %arg0 : i32, i32
  }
}

</mosaic_0001>

<bundles_post_ra>
// kernel: tpu_custom_call.1
= control target key start
LH: loop header
LB: loop body
LE: loop exit
PB: predicated region body
PF: predicated region fallthrough
CT: control target
= control target key end

     0   :  { %8 = vsyncpa [#allocation4], 0  ;;  %s1654_s0 = inlined_call_operand.vmem [shape: bf16[1,64,27], index: 0, kind: input, shape index: {}]   ;;  %s1655_s1 = inlined_call_operand.hbm [shape: bf16[384,256], index: 1, kind: input, shape index: {}]   ;;  %s1656_s2 = inlined_call_operand.vmem [shape: f32[12,384], index: 2, kind: input, shape index: {}]   ;;  %s1657_s3 = inlined_call_operand.hbm [shape: f32[12,24], index: 3, kind: output, shape index: {}]  }
   0x1   :  { %9 = vsyncpa [#allocation5], 0  ;;  %s1365_s12 = smov [#allocation3]   ;;  %s1317_s16 = scalar_lea.hbm %s1655_s1, 6144 }
   0x2   :  { %s17_s13 = sshll.u32 %s1365_s12, 4  ;;  %p1318_p0 = scmp.ne.s32.totalorder %s1655_s1, %s1317_s16  ;;  %s18_s13 = int_to_ptr.vmem [resolvable:$true] %s17_s13 }
   0x3   :  { %p1321_p1 = scmp.lt.u32.totalorder %s1317_s16, %s1655_s1 }
   0x5   :  { %p1323_p2 = pnand %p1321_p1, %p1318_p0 }
   0x7   :  { %1326 = shalt.err (!%p1323_p2)
}
   0x8   :  { %s1327_s21 = scalar_lea.vmem %s18_s13, 6144  ;;  %p1332_p4 = scmp.lt.s32.totalorder %s18_s13, %s18_s13 }
   0x9   :  { %p1328_p3 = scmp.ne.s32.totalorder %s18_s13, %s1327_s21  ;;  %p1333_p5 = scmp.lt.s32.totalorder %s1327_s21, %s1327_s21 }
   0xb   :  { %p1334_p6 = por %p1333_p5, %p1332_p4 }
   0xd   :  { %p1335_p7 = pnand %p1334_p6, %p1328_p3 }
   0xf   :  { %1338 = shalt.err (!%p1335_p7)
}
  0x10   :  { %s1366_s22 = smov 128   ;;  %s1367_s23 = smov 8  }
  0x11   :  { %23 = dma.hbm_to_vmem [thread:$0]  %s1655_s1, 6144, %s18_s13, [#allocation4], %s1366_s22, %s1366_s22, %s1367_s23  }
  0x12   :  { %1361 = dma.done.wait [#allocation4], 6144  }
  0x13   :  { %1362 = vsyncadd [#allocation4], 4294961152  ;;  %v1368_v0 = vmov 0   ;;  %v1227_v1 = vld [vmem:[%s1654_s0] sm:$0xff]   ;;  %v1228_v2 = vld [vmem:[%s1654_s0 + $0x8] sm:$0xff]   ;;  %s1369_s30 = smov 127  }
  0x14   :  { %503 = vmatprep.subr.bf16.mxu0 %v1368_v0  ;;  %1187 = vmatprep.subr.bf16.mxu1 %v1368_v0  ;;  %v1229_v3 = vld [vmem:[%s1654_s0 + $0x10] sm:$0xff]   ;;  %v1230_v4 = vld [vmem:[%s1654_s0 + $0x18] sm:$0xff]   ;;  %v1231_v5 = vld [vmem:[%s1654_s0] sm:$0xff]   ;;  %s1370_s11 = smov 126   ;;  %vm62_vm0 = vcmask 195584   ;;  %s1371_s5 = smov 125  }
  0x15   :  { %95 = vrot.lane.b32.xlu0 %v1227_v1, %s1369_s30  ;;  %99 = vrot.lane.b32.xlu1 %v1229_v3, %s1369_s30  ;;  %v1232_v6 = vld [vmem:[%s1654_s0 + $0x8] sm:$0xff]   ;;  %v1233_v7 = vld [vmem:[%s1654_s0 + $0x10] sm:$0xff]   ;;  %vm935_vm1 = vcmask 191488  }
  0x16   :  { %v1234_v8 = vld [vmem:[%s1654_s0 + $0x18] sm:$0xff]   ;;  %v1235_v9 = vld [vmem:[%s1654_s0] sm:$0xff]   ;;  %v1240_v11 = vld [vmem:[%s1654_s0 + $0x8] sm:$0xff]  }
  0x17   :  { %v1239_v10 = vld [vmem:[%s1654_s0] sm:$0xff]   ;;  %v1236_v12 = vld [vmem:[%s1654_s0 + $0x8] sm:$0xff]   ;;  %v1241_v13 = vld [vmem:[%s1654_s0 + $0x10] sm:$0xff]   ;;  %64 = vst.msk [vmem:[#allocation2 + $0x8] sm:$0xff] %vm62_vm0, %v1240_v11 }
  0x18   :  { %63 = vst.msk [vmem:[#allocation2] sm:$0xff] %vm62_vm0, %v1239_v10  ;;  %v1242_v14 = vld [vmem:[%s1654_s0 + $0x18] sm:$0xff]   ;;  %v1237_v15 = vld [vmem:[%s1654_s0 + $0x10] sm:$0xff]   ;;  %65 = vst.msk [vmem:[#allocation2 + $0x10] sm:$0xff] %vm62_vm0, %v1241_v13 }
  0x19   :  { %97 = vrot.lane.b32.xlu0 %v1228_v2, %s1369_s30  ;;  %101 = vrot.lane.b32.xlu1 %v1230_v4, %s1369_s30  ;;  %66 = vst.msk [vmem:[#allocation2 + $0x18] sm:$0xff] %vm62_vm0, %v1242_v14  ;;  %v1238_v16 = vld [vmem:[%s1654_s0 + $0x18] sm:$0xff]   ;;  %v1278_v26 = vld [vmem:[#allocation3 + $0xf4] ss:$8 sps:$4 sm:$0xff]   ;;  %v1276_v48 = vld [vmem:[#allocation3 + $0xf0] ss:$8 sps:$4 sm:$0xff]  }
  0x1a   :  { %v1245_v21 = vld [vmem:[#allocation3 + $0x4] ss:$8 sps:$4 sm:$0xff]   ;;  %655 = vmatprep.mubr.bf16.mxu1 %v1278_v26  ;;  %v1243_v47 = vld [vmem:[#allocation3] ss:$8 sps:$4 sm:$0xff]   ;;  %v1246_v49 = vld [vmem:[#allocation3 + $0x14] ss:$8 sps:$4 sm:$0xff]  }
  0x1b   :  { %535 = vmatprep.mubr.bf16.mxu0 %v1245_v21  ;;  %v1282_v50 = vld [vmem:[#allocation3 + $0x104] ss:$8 sps:$4 sm:$0xff]   ;;  %v1248_v51 = vld [vmem:[#allocation3 + $0x10] ss:$8 sps:$4 sm:$0xff]   ;;  %v1284_v52 = vld [vmem:[#allocation3 + $0x100] ss:$8 sps:$4 sm:$0xff]  }
  0x1c   :  { %v1249_v53 = vld [vmem:[#allocation3 + $0x24] ss:$8 sps:$4 sm:$0xff]   ;;  %v1288_v54 = vld [vmem:[#allocation3 + $0x114] ss:$8 sps:$4 sm:$0xff]   ;;  %v1251_v55 = vld [vmem:[#allocation3 + $0x20] ss:$8 sps:$4 sm:$0xff]  }
  0x1d   :  { %139 = vrot.lane.b32.xlu0 %v1231_v5, %s1370_s11  ;;  %141 = vrot.lane.b32.xlu1 %v1232_v6, %s1370_s11  ;;  %v1290_v56 = vld [vmem:[#allocation3 + $0x110] ss:$8 sps:$4 sm:$0xff]   ;;  %v1252_v57 = vld [vmem:[#allocation3 + $0x34] ss:$8 sps:$4 sm:$0xff]   ;;  %v1294_v58 = vld [vmem:[#allocation3 + $0x124] ss:$8 sps:$4 sm:$0xff]  }
  0x1e   :  { %v200_v18 = vld [vmem:[#allocation2 + $0x8] sm:$0xff]  ;;  %v1254_v59 = vld [vmem:[#allocation3 + $0x30] ss:$8 sps:$4 sm:$0xff]   ;;  %v1300_v62 = vld [vmem:[#allocation3 + $0x134] ss:$8 sps:$4 sm:$0xff]  }
  0x1f   :  { %v199_v17 = vld [vmem:[#allocation2] sm:$0xff]  ;;  %v201_v19 = vld [vmem:[#allocation2 + $0x10] sm:$0xff] }
  0x20   :  { %504 = vmatpush1.bf16.msra.mxu0 %v199_v17  ;;  %1203 = vmatpush1.bf16.msra.mxu1 %v199_v17  ;;  %v202_v20 = vld [vmem:[#allocation2 + $0x18] sm:$0xff]  ;;  %v1296_v60 = vld [vmem:[#allocation3 + $0x120] ss:$8 sps:$4 sm:$0xff]   ;;  %v1255_v61 = vld [vmem:[#allocation3 + $0x44] ss:$8 sps:$4 sm:$0xff]  }
  0x21   :  { %143 = vrot.lane.b32.xlu0 %v1233_v7, %s1370_s11  ;;  %145 = vrot.lane.b32.xlu1 %v1234_v8, %s1370_s11  ;;  %v1257_v63 = vld [vmem:[#allocation3 + $0x40] ss:$8 sps:$4 sm:$0xff]   ;;  %v1258_v1 = vld [vmem:[#allocation3 + $0x54] ss:$8 sps:$4 sm:$0xff]   ;;  %v1303_v2 = vld [vmem:[#allocation3 + $0x144] ss:$8 sps:$4 sm:$0xff]  }
  0x22   :  { %505 = vmatprep.subr.bf16.mxu0 %v1368_v0  ;;  %1188 = vmatprep.subr.bf16.mxu1 %v1368_v0  ;;  %v1260_v3 = vld [vmem:[#allocation3 + $0x50] ss:$8 sps:$4 sm:$0xff]   ;;  %v1305_v4 = vld [vmem:[#allocation3 + $0x140] ss:$8 sps:$4 sm:$0xff]   ;;  %v1261_v5 = vld [vmem:[#allocation3 + $0x64] ss:$8 sps:$4 sm:$0xff]  }
  0x23   :  { %v1306_v6 = vld [vmem:[#allocation3 + $0x154] ss:$8 sps:$4 sm:$0xff]   ;;  %v1263_v7 = vld [vmem:[#allocation3 + $0x60] ss:$8 sps:$4 sm:$0xff]   ;;  %v1308_v8 = vld [vmem:[#allocation3 + $0x150] ss:$8 sps:$4 sm:$0xff]  }
  0x24   :  { %506 = vmatpush1.bf16.msra.mxu0 %v200_v18  ;;  %1204 = vmatpush1.bf16.msra.mxu1 %v200_v18  ;;  %v1309_v10 = vld [vmem:[#allocation3 + $0x164] ss:$8 sps:$4 sm:$0xff]   ;;  %v1266_v11 = vld [vmem:[#allocation3 + $0x70] ss:$8 sps:$4 sm:$0xff]   ;;  %v1312_v14 = vld [vmem:[#allocation3 + $0x174] ss:$8 sps:$4 sm:$0xff]  }
  0x25   :  { %183 = vrot.lane.b32.xlu0 %v1235_v9, %s1371_s5  ;;  %185 = vrot.lane.b32.xlu1 %v1236_v12, %s1371_s5  ;;  %v1264_v9 = vld [vmem:[#allocation3 + $0x74] ss:$8 sps:$4 sm:$0xff]   ;;  %v1311_v12 = vld [vmem:[#allocation3 + $0x160] ss:$8 sps:$4 sm:$0xff]   ;;  %v1267_v13 = vld [vmem:[#allocation3 + $0x84] ss:$8 sps:$4 sm:$0xff]  }
  0x26   :  { %507 = vmatprep.subr.bf16.mxu0 %v1368_v0  ;;  %1189 = vmatprep.subr.bf16.mxu1 %v1368_v0  ;;  %v1270_v17 = vld [vmem:[#allocation3 + $0x94] ss:$8 sps:$4 sm:$0xff]   ;;  %v1272_v18 = vld [vmem:[#allocation3 + $0x90] ss:$8 sps:$4 sm:$0xff]  }
  0x27   :  { %v1279_v21 = vld [vmem:[#allocation3 + $0xb4] ss:$8 sps:$4 sm:$0xff]   ;;  %v1293_v26 = vld [vmem:[#allocation3 + $0xd0] ss:$8 sps:$4 sm:$0xff]  }
  0x28   :  { %508 = vmatpush1.bf16.msra.mxu0 %v201_v19  ;;  %1205 = vmatpush1.bf16.msra.mxu1 %v201_v19  ;;  %v1273_v19 = vld [vmem:[#allocation3 + $0xa4] ss:$8 sps:$4 sm:$0xff]  }
  0x29   :  { %187 = vrot.lane.b32.xlu0 %v1237_v15, %s1371_s5  ;;  %189 = vrot.lane.b32.xlu1 %v1238_v16, %s1371_s5  ;;  %v1269_v15 = vld [vmem:[#allocation3 + $0x80] ss:$8 sps:$4 sm:$0xff]   ;;  %v1314_v16 = vld [vmem:[#allocation3 + $0x170] ss:$8 sps:$4 sm:$0xff]  }
  0x2a   :  { %509 = vmatprep.subr.bf16.mxu0 %v1368_v0  ;;  %1190 = vmatprep.subr.bf16.mxu1 %v1368_v0 }
  0x2c   :  { %510 = vmatpush1.bf16.msra.mxu0 %v202_v20  ;;  %1206 = vmatpush1.bf16.msra.mxu1 %v202_v20  ;;  %v1275_v20 = vld [vmem:[#allocation3 + $0xa0] ss:$8 sps:$4 sm:$0xff]  }
  0x2d   :  { %511 = vmatprep.subr.bf16.mxu0 %v1368_v0  ;;  %1191 = vmatprep.subr.bf16.mxu1 %v1368_v0 }
  0x87   :  { %v96_v22 = vpop.permute.xlu0 %95  ;;  %v100_v23 = vpop.permute.xlu1 %99 }
  0x88   :  { %107 = vst.msk [vmem:[#allocation2 + $0x20] sm:$0xff] %vm62_vm0, %v96_v22  ;;  %109 = vst.msk [vmem:[#allocation2 + $0x30] sm:$0xff] %vm62_vm0, %v100_v23  ;;  %v1281_v22 = vld [vmem:[#allocation3 + $0xb0] ss:$8 sps:$4 sm:$0xff]   ;;  %v1285_v23 = vld [vmem:[#allocation3 + $0xc4] ss:$8 sps:$4 sm:$0xff]  }
  0x8b   :  { %v98_v24 = vpop.permute.xlu0 %97  ;;  %v102_v25 = vpop.permute.xlu1 %101 }
  0x8c   :  { %108 = vst.msk [vmem:[#allocation2 + $0x28] sm:$0xff] %vm62_vm0, %v98_v24  ;;  %110 = vst.msk [vmem:[#allocation2 + $0x38] sm:$0xff] %vm62_vm0, %v102_v25  ;;  %v1287_v24 = vld [vmem:[#allocation3 + $0xc0] ss:$8 sps:$4 sm:$0xff]   ;;  %v1291_v25 = vld [vmem:[#allocation3 + $0xd4] ss:$8 sps:$4 sm:$0xff]  }
  0x8f   :  { %v203_v27 = vld [vmem:[#allocation2 + $0x20] sm:$0xff]  ;;  %v140_v28 = vpop.permute.xlu0 %139  ;;  %v142_v29 = vpop.permute.xlu1 %141  ;;  %v205_v32 = vld [vmem:[#allocation2 + $0x30] sm:$0xff] }
  0x90   :  { %512 = vmatpush1.bf16.msra.mxu0 %v203_v27  ;;  %1207 = vmatpush1.bf16.msra.mxu1 %v203_v27  ;;  %151 = vst.msk [vmem:[#allocation2 + $0x40] sm:$0xff] %vm62_vm0, %v140_v28  ;;  %152 = vst.msk [vmem:[#allocation2 + $0x48] sm:$0xff] %vm62_vm0, %v142_v29  ;;  %v1297_v27 = vld [vmem:[#allocation3 + $0xe4] ss:$8 sps:$4 sm:$0xff]   ;;  %v1299_v28 = vld [vmem:[#allocation3 + $0xe0] ss:$8 sps:$4 sm:$0xff]  }
  0x91   :  { %513 = vmatprep.subr.bf16.mxu0 %v1368_v0  ;;  %1192 = vmatprep.subr.bf16.mxu1 %v1368_v0  ;;  %v777_v29 = vld [vmem:[%s1656_s2 + $0x8] sm:$0xff] }
  0x93   :  { %v204_v30 = vld [vmem:[#allocation2 + $0x28] sm:$0xff]  ;;  %v144_v31 = vpop.permute.xlu0 %143  ;;  %v146_v33 = vpop.permute.xlu1 %145  ;;  %v206_v35 = vld [vmem:[#allocation2 + $0x38] sm:$0xff] }
  0x94   :  { %514 = vmatpush1.bf16.msra.mxu0 %v204_v30  ;;  %1208 = vmatpush1.bf16.msra.mxu1 %v204_v30  ;;  %153 = vst.msk [vmem:[#allocation2 + $0x50] sm:$0xff] %vm62_vm0, %v144_v31  ;;  %154 = vst.msk [vmem:[#allocation2 + $0x58] sm:$0xff] %vm62_vm0, %v146_v33 }
  0x95   :  { %515 = vmatprep.subr.bf16.mxu0 %v1368_v0  ;;  %1193 = vmatprep.subr.bf16.mxu1 %v1368_v0 }
  0x97   :  { %v184_v34 = vpop.permute.xlu0 %183  ;;  %v186_v36 = vpop.permute.xlu1 %185  ;;  %v207_v38 = vld [vmem:[#allocation2 + $0x40] sm:$0xff]  ;;  %v208_v40 = vld [vmem:[#allocation2 + $0x48] sm:$0xff] }
  0x98   :  { %516 = vmatpush1.bf16.msra.mxu0 %v205_v32  ;;  %1209 = vmatpush1.bf16.msra.mxu1 %v205_v32  ;;  %195 = vst.msk [vmem:[#allocation2 + $0x60] sm:$0xff] %vm62_vm0, %v184_v34  ;;  %196 = vst.msk [vmem:[#allocation2 + $0x68] sm:$0xff] %vm62_vm0, %v186_v36 }
  0x99   :  { %517 = vmatprep.subr.bf16.mxu0 %v1368_v0  ;;  %1194 = vmatprep.subr.bf16.mxu1 %v1368_v0 }
  0x9b   :  { %v188_v37 = vpop.permute.xlu0 %187  ;;  %v190_v39 = vpop.permute.xlu1 %189  ;;  %v209_v41 = vld [vmem:[#allocation2 + $0x50] sm:$0xff]  ;;  %v210_v42 = vld [vmem:[#allocation2 + $0x58] sm:$0xff] }
  0x9c   :  { %518 = vmatpush1.bf16.msra.mxu0 %v206_v35  ;;  %1210 = vmatpush1.bf16.msra.mxu1 %v206_v35  ;;  %197 = vst.msk [vmem:[#allocation2 + $0x70] sm:$0xff] %vm62_vm0, %v188_v37  ;;  %198 = vst.msk [vmem:[#allocation2 + $0x78] sm:$0xff] %vm62_vm0, %v190_v39 }
  0x9d   :  { %519 = vmatprep.subr.bf16.mxu0 %v1368_v0  ;;  %1195 = vmatprep.subr.bf16.mxu1 %v1368_v0 }
  0x9f   :  { %v211_v43 = vld [vmem:[#allocation2 + $0x60] sm:$0xff]  ;;  %v212_v44 = vld [vmem:[#allocation2 + $0x68] sm:$0xff] }
  0xa0   :  { %520 = vmatpush1.bf16.msra.mxu0 %v207_v38  ;;  %1211 = vmatpush1.bf16.msra.mxu1 %v207_v38 }
  0xa1   :  { %521 = vmatprep.subr.bf16.mxu0 %v1368_v0  ;;  %1196 = vmatprep.subr.bf16.mxu1 %v1368_v0 }
  0xa3   :  { %v213_v45 = vld [vmem:[#allocation2 + $0x70] sm:$0xff]  ;;  %v214_v46 = vld [vmem:[#allocation2 + $0x78] sm:$0xff] }
  0xa4   :  { %522 = vmatpush1.bf16.msra.mxu0 %v208_v40  ;;  %1212 = vmatpush1.bf16.msra.mxu1 %v208_v40 }
  0xa5   :  { %523 = vmatprep.subr.bf16.mxu0 %v1368_v0  ;;  %1197 = vmatprep.subr.bf16.mxu1 %v1368_v0 }
  0xa8   :  { %524 = vmatpush1.bf16.msra.mxu0 %v209_v41  ;;  %1213 = vmatpush1.bf16.msra.mxu1 %v209_v41 }
  0xa9   :  { %525 = vmatprep.subr.bf16.mxu0 %v1368_v0  ;;  %1198 = vmatprep.subr.bf16.mxu1 %v1368_v0 }
  0xac   :  { %526 = vmatpush1.bf16.msra.mxu0 %v210_v42  ;;  %1214 = vmatpush1.bf16.msra.mxu1 %v210_v42 }
  0xad   :  { %527 = vmatprep.subr.bf16.mxu0 %v1368_v0  ;;  %1199 = vmatprep.subr.bf16.mxu1 %v1368_v0 }
  0xb0   :  { %528 = vmatpush1.bf16.msra.mxu0 %v211_v43  ;;  %1215 = vmatpush1.bf16.msra.mxu1 %v211_v43 }
  0xb1   :  { %529 = vmatprep.subr.bf16.mxu0 %v1368_v0  ;;  %1200 = vmatprep.subr.bf16.mxu1 %v1368_v0 }
  0xb4   :  { %530 = vmatpush1.bf16.msra.mxu0 %v212_v44  ;;  %1216 = vmatpush1.bf16.msra.mxu1 %v212_v44 }
  0xb5   :  { %531 = vmatprep.subr.bf16.mxu0 %v1368_v0  ;;  %1201 = vmatprep.subr.bf16.mxu1 %v1368_v0 }
  0xb8   :  { %532 = vmatpush1.bf16.msra.mxu0 %v213_v45  ;;  %1217 = vmatpush1.bf16.msra.mxu1 %v213_v45 }
  0xb9   :  { %533 = vmatprep.subr.bf16.mxu0 %v1368_v0  ;;  %1202 = vmatprep.subr.bf16.mxu1 %v1368_v0  ;;  %v1302_v0 = vld [vmem:[#allocation3 + $0x130] ss:$8 sps:$4 sm:$0xff]  }
  0xbc   :  { %534 = vmatpush1.bf16.msra.mxu0 %v214_v46  ;;  %1218 = vmatpush1.bf16.msra.mxu1 %v214_v46 }
  0xbf   :  { %536 = vmatmul.mubr.bf16.vlgmr.msra.gmra.mrb[0].mxu0 %v1243_v47  ;;  %656 = vmatmul.mubr.bf16.vlgmr.msra.gmra.mrb[0].mxu1 %v1276_v48 }
  0xc0   :  { %543 = vmatprep.mubr.bf16.mxu0 %v1246_v49  ;;  %663 = vmatprep.mubr.bf16.mxu1 %v1282_v50 }
  0xc7   :  { %544 = vmatmul.mubr.bf16.gmra.mrb[4].mxu0 %v1248_v51  ;;  %664 = vmatmul.mubr.bf16.gmra.mrb[4].mxu1 %v1284_v52 }
  0xc8   :  { %551 = vmatprep.mubr.bf16.mxu0 %v1249_v53  ;;  %671 = vmatprep.mubr.bf16.mxu1 %v1288_v54 }
  0xcf   :  { %552 = vmatmul.mubr.bf16.gmra.mrb[8].mxu0 %v1251_v55  ;;  %672 = vmatmul.mubr.bf16.gmra.mrb[8].mxu1 %v1290_v56 }
  0xd0   :  { %559 = vmatprep.mubr.bf16.mxu0 %v1252_v57  ;;  %679 = vmatprep.mubr.bf16.mxu1 %v1294_v58 }
  0xd7   :  { %560 = vmatmul.mubr.bf16.gmra.mrb[12].mxu0 %v1254_v59  ;;  %680 = vmatmul.mubr.bf16.gmra.mrb[12].mxu1 %v1296_v60 }
  0xd8   :  { %567 = vmatprep.mubr.bf16.mxu0 %v1255_v61  ;;  %687 = vmatprep.mubr.bf16.mxu1 %v1300_v62 }
  0xdf   :  { %568 = vmatmul.mubr.bf16.gmra.mrb[16].mxu0 %v1257_v63  ;;  %688 = vmatmul.mubr.bf16.gmra.mrb[16].mxu1 %v1302_v0 }
  0xe0   :  { %575 = vmatprep.mubr.bf16.mxu0 %v1258_v1  ;;  %695 = vmatprep.mubr.bf16.mxu1 %v1303_v2 }
  0xe7   :  { %576 = vmatmul.mubr.bf16.gmra.mrb[20].mxu0 %v1260_v3  ;;  %696 = vmatmul.mubr.bf16.gmra.mrb[20].mxu1 %v1305_v4 }
  0xe8   :  { %583 = vmatprep.mubr.bf16.mxu0 %v1261_v5  ;;  %703 = vmatprep.mubr.bf16.mxu1 %v1306_v6 }
  0xef   :  { %584 = vmatmul.mubr.bf16.gmra.mrb[24].mxu0 %v1263_v7  ;;  %704 = vmatmul.mubr.bf16.gmra.mrb[24].mxu1 %v1308_v8 }
  0xf0   :  { %591 = vmatprep.mubr.bf16.mxu0 %v1264_v9  ;;  %711 = vmatprep.mubr.bf16.mxu1 %v1309_v10 }
  0xf7   :  { %592 = vmatmul.mubr.bf16.gmra.mrb[28].mxu0 %v1266_v11  ;;  %712 = vmatmul.mubr.bf16.gmra.mrb[28].mxu1 %v1311_v12 }
  0xf8   :  { %599 = vmatprep.mubr.bf16.mxu0 %v1267_v13  ;;  %719 = vmatprep.mubr.bf16.mxu1 %v1312_v14 }
  0xff   :  { %600 = vmatmul.mubr.bf16.gmra.mrb[32].mxu0 %v1269_v15  ;;  %720 = vmatmul.mubr.bf16.gmra.mrb[32].mxu1 %v1314_v16 }
 0x100   :  { %607 = vmatprep.mubr.bf16.mxu0 %v1270_v17  ;;  %846 = vmatprep.mubr.f32.mxu1 %v777_v29 }
 0x107   :  { %608 = vmatmul.mubr.bf16.gmra.mrb[36].mxu0 %v1272_v18 }
 0x108   :  { %615 = vmatprep.mubr.bf16.mxu0 %v1273_v19 }
 0x10f   :  { %616 = vmatmul.mubr.bf16.gmra.mrb[40].mxu0 %v1275_v20 }
 0x110   :  { %623 = vmatprep.mubr.bf16.mxu0 %v1279_v21 }
 0x117   :  { %624 = vmatmul.mubr.bf16.gmra.mrb[44].mxu0 %v1281_v22 }
 0x118   :  { %631 = vmatprep.mubr.bf16.mxu0 %v1285_v23 }
 0x11f   :  { %632 = vmatmul.mubr.bf16.gmra.mrb[48].mxu0 %v1287_v24 }
 0x120   :  { %639 = vmatprep.mubr.bf16.mxu0 %v1291_v25 }
 0x127   :  { %640 = vmatmul.mubr.bf16.gmra.mrb[52].mxu0 %v1293_v26 }
 0x128   :  { %647 = vmatprep.mubr.bf16.mxu0 %v1297_v27 }
 0x12f   :  { %648 = vmatmul.mubr.bf16.gmra.mrb[56].mxu0 %v1299_v28 }
 0x192   :  { %v537_v30 = vpop.f32.mrb[0].mxu0  ;;  %v657_v31 = vpop.f32.mrb[0].mxu1 }
 0x193   :  { %v539_v32 = vpop.f32.mrb[1].mxu0  ;;  %v1507_v33 = vmul.f32 %v657_v31, %v657_v31  ;;  %v659_v34 = vpop.f32.mrb[1].mxu1  ;;  %v1509_v37 = vmul.f32 %v537_v30, %v537_v30 }
 0x194   :  { %v540_v35 = vpop.f32.mrb[2].mxu0  ;;  %v660_v36 = vpop.f32.mrb[2].mxu1 }
 0x195   :  { %v1511_v38 = vmul.f32 %v540_v35, %v540_v35  ;;  %v542_v39 = vpop.f32.mrb[3].mxu0  ;;  %v1513_v40 = vmul.f32 %v660_v36, %v660_v36  ;;  %v662_v41 = vpop.f32.mrb[3].mxu1 }
 0x197   :  { %v1125_v42 = vpack.c.bf16 %v1511_v38, %v1509_v37  ;;  %v1151_v43 = vpack.c.bf16 %v1513_v40, %v1507_v33  ;;  %v779_v33 = vld [vmem:[%s1656_s2 + $0x18] sm:$0xf]  ;;  %v778_v40 = vld [vmem:[%s1656_s2 + $0x10] sm:$0xff] }
 0x19a   :  { %v545_v44 = vpop.f32.mrb[4].mxu0  ;;  %v665_v45 = vpop.f32.mrb[4].mxu1 }
 0x19b   :  { %v547_v46 = vpop.f32.mrb[5].mxu0  ;;  %v760_v47 = vmul.f32 %v665_v45, %v665_v45  ;;  %v667_v48 = vpop.f32.mrb[5].mxu1  ;;  %v1519_v51 = vmul.f32 %v545_v44, %v545_v44 }
 0x19c   :  { %v548_v49 = vpop.f32.mrb[6].mxu0  ;;  %v668_v50 = vpop.f32.mrb[6].mxu1 }
 0x19d   :  { %v1521_v52 = vmul.f32 %v548_v49, %v548_v49  ;;  %v550_v53 = vpop.f32.mrb[7].mxu0  ;;  %v761_v54 = vmul.f32 %v668_v50, %v668_v50  ;;  %v670_v55 = vpop.f32.mrb[7].mxu1 }
 0x19f   :  { %v1129_v56 = vpack.c.bf16 %v1521_v52, %v1519_v51  ;;  %v1525_v57 = vpack.c.bf16 %v761_v54, %v760_v47 }
 0x1a2   :  { %v553_v58 = vpop.f32.mrb[8].mxu0  ;;  %v673_v59 = vpop.f32.mrb[8].mxu1 }
 0x1a3   :  { %v555_v60 = vpop.f32.mrb[9].mxu0  ;;  %v762_v61 = vmul.f32 %v673_v59, %v673_v59  ;;  %v675_v62 = vpop.f32.mrb[9].mxu1  ;;  %v1527_v1 = vmul.f32 %v553_v58, %v553_v58 }
 0x1a4   :  { %v556_v63 = vpop.f32.mrb[10].mxu0  ;;  %v676_v0 = vpop.f32.mrb[10].mxu1 }
 0x1a5   :  { %v1529_v2 = vmul.f32 %v556_v63, %v556_v63  ;;  %v558_v3 = vpop.f32.mrb[11].mxu0  ;;  %v763_v4 = vmul.f32 %v676_v0, %v676_v0  ;;  %v678_v5 = vpop.f32.mrb[11].mxu1 }
 0x1a7   :  { %v1133_v6 = vpack.c.bf16 %v1529_v2, %v1527_v1  ;;  %v1533_v7 = vpack.c.bf16 %v763_v4, %v762_v61 }
 0x1aa   :  { %v561_v8 = vpop.f32.mrb[12].mxu0  ;;  %v681_v9 = vpop.f32.mrb[12].mxu1 }
 0x1ab   :  { %v563_v10 = vpop.f32.mrb[13].mxu0  ;;  %v764_v11 = vmul.f32 %v681_v9, %v681_v9  ;;  %v683_v12 = vpop.f32.mrb[13].mxu1  ;;  %v1535_v15 = vmul.f32 %v561_v8, %v561_v8 }
 0x1ac   :  { %v564_v13 = vpop.f32.mrb[14].mxu0  ;;  %v684_v14 = vpop.f32.mrb[14].mxu1 }
 0x1ad   :  { %v1537_v16 = vmul.f32 %v564_v13, %v564_v13  ;;  %v566_v17 = vpop.f32.mrb[15].mxu0  ;;  %v765_v18 = vmul.f32 %v684_v14, %v684_v14  ;;  %v686_v19 = vpop.f32.mrb[15].mxu1 }
 0x1af   :  { %v1137_v20 = vpack.c.bf16 %v1537_v16, %v1535_v15  ;;  %v1541_v21 = vpack.c.bf16 %v765_v18, %v764_v11 }
 0x1b2   :  { %v569_v22 = vpop.f32.mrb[16].mxu0  ;;  %v689_v23 = vpop.f32.mrb[16].mxu1 }
 0x1b3   :  { %v571_v24 = vpop.f32.mrb[17].mxu0  ;;  %v766_v25 = vmul.f32 %v689_v23, %v689_v23  ;;  %v691_v26 = vpop.f32.mrb[17].mxu1  ;;  %v1543_v29 = vmul.f32 %v569_v22, %v569_v22 }
 0x1b4   :  { %v572_v27 = vpop.f32.mrb[18].mxu0  ;;  %v692_v28 = vpop.f32.mrb[18].mxu1 }
 0x1b5   :  { %v1545_v30 = vmul.f32 %v572_v27, %v572_v27  ;;  %v574_v31 = vpop.f32.mrb[19].mxu0  ;;  %v767_v32 = vmul.f32 %v692_v28, %v692_v28  ;;  %v694_v34 = vpop.f32.mrb[19].mxu1 }
 0x1b7   :  { %v1141_v35 = vpack.c.bf16 %v1545_v30, %v1543_v29  ;;  %v1549_v36 = vpack.c.bf16 %v767_v32, %v766_v25  ;;  %v776_v29 = vld [vmem:[%s1656_s2] sm:$0xff] }
 0x1b8   :  { %v780_v30 = vld [vmem:[%s1656_s2 + $0x20] sm:$0xf] }
 0x1ba   :  { %v577_v39 = vpop.f32.mrb[20].mxu0  ;;  %v697_v41 = vpop.f32.mrb[20].mxu1 }
 0x1bb   :  { %v579_v44 = vpop.f32.mrb[21].mxu0  ;;  %v768_v45 = vmul.f32 %v697_v41, %v697_v41  ;;  %v699_v46 = vpop.f32.mrb[21].mxu1  ;;  %v1551_v49 = vmul.f32 %v577_v39, %v577_v39 }
 0x1bc   :  { %v580_v47 = vpop.f32.mrb[22].mxu0  ;;  %v700_v48 = vpop.f32.mrb[22].mxu1 }
 0x1bd   :  { %v1553_v50 = vmul.f32 %v580_v47, %v580_v47  ;;  %v582_v53 = vpop.f32.mrb[23].mxu0  ;;  %v769_v54 = vmul.f32 %v700_v48, %v700_v48  ;;  %v702_v55 = vpop.f32.mrb[23].mxu1 }
 0x1bf   :  { %v1145_v58 = vpack.c.bf16 %v1553_v50, %v1551_v49  ;;  %v1557_v59 = vpack.c.bf16 %v769_v54, %v768_v45 }
 0x1c2   :  { %v585_v60 = vpop.f32.mrb[24].mxu0  ;;  %v705_v61 = vpop.f32.mrb[24].mxu1 }
 0x1c3   :  { %v587_v62 = vpop.f32.mrb[25].mxu0  ;;  %v770_v63 = vmul.f32 %v705_v61, %v705_v61  ;;  %v707_v0 = vpop.f32.mrb[25].mxu1  ;;  %v1559_v5 = vmul.f32 %v585_v60, %v585_v60 }
 0x1c4   :  { %v588_v3 = vpop.f32.mrb[26].mxu0  ;;  %v708_v4 = vpop.f32.mrb[26].mxu1 }
 0x1c5   :  { %v1561_v8 = vmul.f32 %v588_v3, %v588_v3  ;;  %v590_v9 = vpop.f32.mrb[27].mxu0  ;;  %v771_v10 = vmul.f32 %v708_v4, %v708_v4  ;;  %v710_v11 = vpop.f32.mrb[27].mxu1 }
 0x1c7   :  { %v1149_v12 = vpack.c.bf16 %v1561_v8, %v1559_v5  ;;  %v1565_v13 = vpack.c.bf16 %v771_v10, %v770_v63 }
 0x1ca   :  { %v593_v14 = vpop.f32.mrb[28].mxu0  ;;  %v713_v17 = vpop.f32.mrb[28].mxu1 }
 0x1cb   :  { %v595_v18 = vpop.f32.mrb[29].mxu0  ;;  %v772_v19 = vmul.f32 %v713_v17, %v713_v17  ;;  %v715_v22 = vpop.f32.mrb[29].mxu1  ;;  %v1567_v25 = vmul.f32 %v593_v14, %v593_v14 }
 0x1cc   :  { %v596_v23 = vpop.f32.mrb[30].mxu0  ;;  %v716_v24 = vpop.f32.mrb[30].mxu1 }
 0x1cd   :  { %v1569_v26 = vmul.f32 %v596_v23, %v596_v23  ;;  %v598_v27 = vpop.f32.mrb[31].mxu0  ;;  %v773_v28 = vmul.f32 %v716_v24, %v716_v24  ;;  %v718_v31 = vpop.f32.mrb[31].mxu1 }
 0x1cf   :  { %v1153_v32 = vpack.c.bf16 %v1569_v26, %v1567_v25  ;;  %v1573_v34 = vpack.c.bf16 %v773_v28, %v772_v19 }
 0x1d2   :  { %v601_v39 = vpop.f32.mrb[32].mxu0  ;;  %v721_v41 = vpop.f32.mrb[32].mxu1 }
 0x1d3   :  { %v603_v44 = vpop.f32.mrb[33].mxu0  ;;  %v774_v45 = vmul.f32 %v721_v41, %v721_v41  ;;  %v723_v46 = vpop.f32.mrb[33].mxu1  ;;  %v744_v53 = vmul.f32 %v601_v39, %v601_v39 }
 0x1d4   :  { %v604_v47 = vpop.f32.mrb[34].mxu0  ;;  %v724_v48 = vpop.f32.mrb[34].mxu1 }
 0x1d5   :  { %v745_v54 = vmul.f32 %v604_v47, %v604_v47  ;;  %v606_v55 = vpop.f32.mrb[35].mxu0  ;;  %v775_v60 = vmul.f32 %v724_v48, %v724_v48  ;;  %v726_v61 = vpop.f32.mrb[35].mxu1 }
 0x1d7   :  { %v1123_v62 = vpack.c.bf16 %v745_v54, %v744_v53  ;;  %v1575_v63 = vpack.c.bf16 %v775_v60, %v774_v45 }
 0x1d9   :  { %1124 = vmatprep.subr.bf16.mxu1 %v1123_v62 }
 0x1da   :  { %v609_v0 = vpop.f32.mrb[36].mxu0  ;;  %1126 = vmatpush3.bf16.msra.mxu1 %v1125_v42 }
 0x1db   :  { %v611_v3 = vpop.f32.mrb[37].mxu0  ;;  %v746_v9 = vmul.f32 %v609_v0, %v609_v0 }
 0x1dc   :  { %v612_v4 = vpop.f32.mrb[38].mxu0 }
 0x1dd   :  { %v747_v10 = vmul.f32 %v612_v4, %v612_v4  ;;  %v614_v11 = vpop.f32.mrb[39].mxu0 }
 0x1df   :  { %v1127_v14 = vpack.c.bf16 %v747_v10, %v746_v9 }
 0x1e1   :  { %1128 = vmatprep.subr.bf16.mxu1 %v1127_v14 }
 0x1e2   :  { %v617_v17 = vpop.f32.mrb[40].mxu0  ;;  %1130 = vmatpush3.bf16.msra.mxu1 %v1129_v56 }
 0x1e3   :  { %v619_v18 = vpop.f32.mrb[41].mxu0  ;;  %v748_v22 = vmul.f32 %v617_v17, %v617_v17 }
 0x1e4   :  { %v620_v19 = vpop.f32.mrb[42].mxu0 }
 0x1e5   :  { %v749_v23 = vmul.f32 %v620_v19, %v620_v19  ;;  %v622_v24 = vpop.f32.mrb[43].mxu0 }
 0x1e7   :  { %v1131_v27 = vpack.c.bf16 %v749_v23, %v748_v22 }
 0x1e9   :  { %1132 = vmatprep.subr.bf16.mxu1 %v1131_v27 }
 0x1ea   :  { %v625_v37 = vpop.f32.mrb[44].mxu0  ;;  %1134 = vmatpush3.bf16.msra.mxu1 %v1133_v6 }
 0x1eb   :  { %v627_v38 = vpop.f32.mrb[45].mxu0  ;;  %v750_v28 = vmul.f32 %v625_v37, %v625_v37 }
 0x1ec   :  { %v628_v42 = vpop.f32.mrb[46].mxu0 }
 0x1ed   :  { %v751_v31 = vmul.f32 %v628_v42, %v628_v42  ;;  %v630_v39 = vpop.f32.mrb[47].mxu0 }
 0x1ef   :  { %v1135_v41 = vpack.c.bf16 %v751_v31, %v750_v28 }
 0x1f1   :  { %1136 = vmatprep.subr.bf16.mxu1 %v1135_v41 }
 0x1f2   :  { %v633_v51 = vpop.f32.mrb[48].mxu0  ;;  %1138 = vmatpush3.bf16.msra.mxu1 %v1137_v20 }
 0x1f3   :  { %v635_v52 = vpop.f32.mrb[49].mxu0  ;;  %v752_v44 = vmul.f32 %v633_v51, %v633_v51 }
 0x1f4   :  { %v636_v56 = vpop.f32.mrb[50].mxu0 }
 0x1f5   :  { %v753_v45 = vmul.f32 %v636_v56, %v636_v56  ;;  %v638_v46 = vpop.f32.mrb[51].mxu0 }
 0x1f7   :  { %v1139_v47 = vpack.c.bf16 %v753_v45, %v752_v44 }
 0x1f9   :  { %1140 = vmatprep.subr.bf16.mxu1 %v1139_v47 }
 0x1fa   :  { %v641_v1 = vpop.f32.mrb[52].mxu0  ;;  %1142 = vmatpush3.bf16.msra.mxu1 %v1141_v35 }
 0x1fb   :  { %v643_v2 = vpop.f32.mrb[53].mxu0  ;;  %v754_v48 = vmul.f32 %v641_v1, %v641_v1 }
 0x1fc   :  { %v644_v6 = vpop.f32.mrb[54].mxu0 }
 0x1fd   :  { %v755_v53 = vmul.f32 %v644_v6, %v644_v6  ;;  %v646_v54 = vpop.f32.mrb[55].mxu0 }
 0x1ff   :  { %v1143_v55 = vpack.c.bf16 %v755_v53, %v754_v48 }
 0x201   :  { %1144 = vmatprep.subr.bf16.mxu1 %v1143_v55 }
 0x202   :  { %v649_v15 = vpop.f32.mrb[56].mxu0  ;;  %1146 = vmatpush3.bf16.msra.mxu1 %v1145_v58 }
 0x203   :  { %v651_v16 = vpop.f32.mrb[57].mxu0  ;;  %v756_v60 = vmul.f32 %v649_v15, %v649_v15 }
 0x204   :  { %v652_v20 = vpop.f32.mrb[58].mxu0 }
 0x205   :  { %v757_v61 = vmul.f32 %v652_v20, %v652_v20  ;;  %v654_v62 = vpop.f32.mrb[59].mxu0 }
 0x207   :  { %v1147_v0 = vpack.c.bf16 %v757_v61, %v756_v60 }
 0x209   :  { %1148 = vmatprep.subr.bf16.mxu1 %v1147_v0 }
 0x20a   :  { %1150 = vmatpush3.bf16.msra.mxu1 %v1149_v12 }
 0x20b   :  { %1152 = vmatprep.subr.bf16.mxu1 %v1151_v43  ;;  %v781_v43 = vld [vmem:[%s1656_s2 + $0x28] sm:$0xf]  ;;  %s1372_s2 = smov [#allocation6]  }
 0x20c   :  { %s956_s18 = sshll.u32 %s1372_s2, 4  ;;  %s957_s18 = int_to_ptr.vmem [resolvable:$true] %s956_s18 }
 0x20d   :  { %s1339_s19 = scalar_lea.vmem %s957_s18, 256  ;;  %p1344_p9 = scmp.lt.s32.totalorder %s957_s18, %s957_s18 }
 0x20e   :  { %1154 = vmatpush3.bf16.msra.mxu1 %v1153_v32  ;;  %p1340_p8 = scmp.ne.s32.totalorder %s957_s18, %s1339_s19  ;;  %p1345_p10 = scmp.lt.s32.totalorder %s1339_s19, %s1339_s19 }
 0x20f   :  { %1156 = vmatprep.subr.bf16.mxu1 %v1525_v57 }
 0x210   :  { %p1346_p11 = por %p1345_p10, %p1344_p9 }
 0x211   :  { %847 = vmatmul.mubr.f32.vlgmr.msra.gmra.mrb[36].mxu1 %v776_v29 }
 0x212   :  { %1158 = vmatpush3.bf16.msra.mxu1 %v1525_v57  ;;  %851 = vmatprep.mubr.f32.mxu1 %v780_v30  ;;  %p1347_p12 = pnand %p1346_p11, %p1340_p8 }
 0x213   :  { %1160 = vmatprep.subr.bf16.mxu1 %v1533_v7 }
 0x215   :  { %852 = vmatmul.mubr.f32.gmra.mrb[38].mxu1 %v779_v33 }
 0x216   :  { %1162 = vmatpush3.bf16.msra.mxu1 %v1533_v7  ;;  %1120 = vmatprep.mubr.f32.mxu1 %v778_v40 }
 0x217   :  { %1164 = vmatprep.subr.bf16.mxu1 %v1541_v21 }
 0x21a   :  { %1166 = vmatpush3.bf16.msra.mxu1 %v1541_v21 }
 0x21b   :  { %1168 = vmatprep.subr.bf16.mxu1 %v1549_v36 }
 0x21e   :  { %1170 = vmatpush3.bf16.msra.mxu1 %v1549_v36 }
 0x21f   :  { %1172 = vmatprep.subr.bf16.mxu1 %v1557_v59 }
 0x222   :  { %1174 = vmatpush3.bf16.msra.mxu1 %v1557_v59 }
 0x223   :  { %1176 = vmatprep.subr.bf16.mxu1 %v1565_v13 }
 0x226   :  { %1178 = vmatpush3.bf16.msra.mxu1 %v1565_v13 }
 0x227   :  { %1180 = vmatprep.subr.bf16.mxu1 %v1573_v34 }
 0x22a   :  { %1182 = vmatpush3.bf16.msra.mxu1 %v1573_v34 }
 0x22b   :  { %1184 = vmatprep.subr.bf16.mxu1 %v1575_v63 }
 0x22e   :  { %1186 = vmatpush3.bf16.msra.mxu1 %v1575_v63 }
 0x231   :  { %1121 = vmatmul.mubr.f32.vlgmr.msra.gmra.mrb[40].mxu1 %v781_v43 }
 0x2e4   :  { %v1064_v57 = vpop.f32.mrb[36].mxu1 }
 0x2e5   :  { %v1065_v7 = vpop.f32.mrb[37].mxu1 }
 0x2e6   :  { %v1066_v21 = vadd.f32 %v1065_v7, %v1064_v57 }
 0x2e8   :  { %v1067_v35 = vpop.f32.mrb[38].mxu1 }
 0x2e9   :  { %v1068_v36 = vpop.f32.mrb[39].mxu1 }
 0x2ea   :  { %v1069_v49 = vadd.f32 %v1068_v36, %v1067_v35 }
 0x304   :  { %v1122_v50 = vpop.f32.mrb[40].mxu1 }
 0x305   :  { %v929_v58 = vadd.f32 %v1122_v50, %v1069_v49  ;;  %v923_v59 = vpop.f32.mrb[41].mxu1 }
 0x306   :  { %v924_v5 = vadd.f32 %v1066_v21, %v923_v59 }
 0x307   :  { %v933_v8 = vand.u32 2147483647, %v929_v58 }
 0x308   :  { %v932_v12 = vand.u32 2147483647, %v924_v5 }
 0x309   :  { %v936_v13 = vsel %vm935_vm1, %v933_v8, -inf }
 0x30a   :  { %v934_v25 = vsel %vm62_vm0, %v932_v12, -inf }
 0x30b   :  { %v937_v26 = vmax.f32 %v934_v25, %v936_v13 }
 0x30d   :  { %v938_v32 = vrot.slane %v937_v26, 4 }
 0x30f   :  { %v939_v34 = vmax.f32 %v937_v26, %v938_v32 }
 0x311   :  { %v940_v63 = vrot.slane %v939_v34, 2 }
 0x313   :  { %v941_v3 = vmax.f32 %v939_v34, %v940_v63 }
 0x315   :  { %v942_v4 = vrot.slane %v941_v3, 1 }
 0x317   :  { %v943_v9 = vmax.f32 %v941_v3, %v942_v4 }
 0x319   :  { %vm944_vm2 = vcmp.lt.f32.partialorder %v943_v9, 1.1754944e-38 }
 0x31a   :  { %v945_v10 = vsel %vm944_vm2, 1.0, %v943_v9 }
 0x31b   :  { %1315 = vrcp.f32 %v945_v10 }
 0x325   :  { %v1316_v11 = vpop.eup %1315 }
 0x326   :  { %v947_v14 = vmul.f32 %v1316_v11, %v924_v5  ;;  %v948_v17 = vmul.f32 %v1316_v11, %v929_v58 }
 0x328   :  { %949 = vst.msk [vmem:[#allocation6] sm:$0xff] %vm62_vm0, %v947_v14 }
 0x329   :  { %950 = vst.msk [vmem:[#allocation6 + $0x8] sm:$0xf] %vm935_vm1, %v948_v17 }
 0x32a   :  { %1350 = shalt.err (!%p1347_p12)
}
 0x32b   :  { %s1351_s24 = scalar_lea.hbm %s1657_s3, 256 }
 0x32c   :  { %p1352_p13 = scmp.ne.s32.totalorder %s1657_s3, %s1351_s24  ;;  %p1355_p0 = scmp.lt.u32.totalorder %s1351_s24, %s1657_s3 }
 0x32e   :  { %p1357_p1 = pnand %p1355_p0, %p1352_p13 }
 0x330   :  { %1360 = shalt.err (!%p1357_p1)
}
 0x331   :  { %962 = dma.vmem_to_hbm [thread:$0]  %s957_s18, 256, %s1657_s3, [#allocation5], %s1366_s22, %s1366_s22, %s1367_s23  }
 0x332   :  { %1363 = dma.done.wait [#allocation5], 256  }
 0x333   :  { %1364 = vsyncadd [#allocation5], 4294967040 }
 0x334   :  { %966 = vsyncpa [#allocation4], 1 }
 0x335   :  { %967 = vsyncpa [#allocation5], 1 }

</bundles_post_ra>
